<compile_context>
chip_gen: v5e
topology: v5e:2x2
jax: 0.10.0
libtpu: 0.0.40
codegen_flags: <defaults>
</compile_context>

<pallas_src>
import jax
import jax.numpy as jnp
from jax.experimental import pallas as pl
from jax.experimental.pallas import tpu as pltpu

LANE = 128
SUBLANE = 8
OUT_PAD = 8  # 3 logits padded to one sublane group; batch rides the lane axis


def _round_up(n, m):
    return ((n + m - 1) // m) * m


def _pad2(a, rows, cols):
    r, c = a.shape
    return jnp.pad(a, ((0, rows - r), (0, cols - c)))


def _mlp_kernel(xT_ref, w1_ref, b1_ref, w2_ref, b2_ref, w3_ref, b3_ref, o_ref):
    """Feature-major fused MLP. Features on sublanes, batch on lanes:
    no transposes, no slices, every HBM store is lane-dense."""
    # fc1 + ReLU: (H1P, 4) @ (4, TB) -> (H1P, TB); f32 MXU accumulation,
    # bias add / ReLU ride the VPU in f32.
    h1 = jnp.dot(w1_ref[...], xT_ref[...], preferred_element_type=jnp.float32)
    h1 = jnp.maximum(h1 + b1_ref[...], 0.0).astype(w2_ref.dtype)
    # fc2 + ReLU: (H2P, H1P) @ (H1P, TB) -> (H2P, TB)
    h2 = jnp.dot(w2_ref[...], h1, preferred_element_type=jnp.float32)
    h2 = jnp.maximum(h2 + b2_ref[...], 0.0).astype(w3_ref.dtype)
    # out head: (OUT_PAD, H2P) @ (H2P, TB) -> (OUT_PAD, TB); compact store.
    logits = jnp.dot(w3_ref[...], h2, preferred_element_type=jnp.float32)
    o_ref[...] = (logits + b3_ref[...]).astype(o_ref.dtype)


def prepare_params(params, compute_dtype=jnp.bfloat16):
    """Pad / cast PyTorch-layout params ONCE (hoisted out of the per-call path).

    params (nn.Linear layout, (out_features, in_features) weights):
      w1 (25, 4), b1 (25,), w2 (30, 25), b2 (30,), w3 (3, 30), b3 (3,)
    Padded lanes/rows are zero, so ReLU keeps them at exactly 0 and the extra
    output rows are sliced off in the wrapper -> identical math.
    """
    in_f = params["w1"].shape[1]
    h1p = _round_up(params["w1"].shape[0], LANE)   # 25 -> 128
    h2p = _round_up(params["w2"].shape[0], LANE)   # 30 -> 128
    outp = _round_up(params["w3"].shape[0], OUT_PAD)  # 3 -> 8

    def col(b, rows):
        return _pad2(b.reshape(-1, 1).astype(jnp.float32), rows, 1)

    return {
        "w1": _pad2(params["w1"], h1p, in_f).astype(compute_dtype),
        "b1": col(params["b1"], h1p),
        "w2": _pad2(params["w2"], h2p, h1p).astype(compute_dtype),
        "b2": col(params["b2"], h2p),
        "w3": _pad2(params["w3"], outp, h2p).astype(compute_dtype),
        "b3": col(params["b3"], outp),
    }


def _choose_tiling(batch, block_batch):
    """Padded batch Bp and tile TB such that TB | Bp and blocks are well-formed."""
    bp = _round_up(max(batch, 1), SUBLANE)
    if bp <= 256:
        # Tiny batch: a single full block (block shape == full array shape).
        return bp, bp
    # >=2 grid steps (v7x has 2 TensorCores) and lane-dense TB (multiple of 128).
    tb = _round_up(min(block_batch, -(-bp // 2)), LANE)
    bp = _round_up(bp, tb)  # TB divides Bp -> no partial edge block
    return bp, tb


def iris_classifier_forward(x, padded_params, *, num_classes=3, block_batch=4096):
    """x: (B, 4) float32.  padded_params: output of prepare_params."""
    w1, b1 = padded_params["w1"], padded_params["b1"]
    w2, b2 = padded_params["w2"], padded_params["b2"]
    w3, b3 = padded_params["w3"], padded_params["b3"]
    compute_dtype = w1.dtype
    h1p, in_f = w1.shape
    h2p = w2.shape[0]
    outp = w3.shape[0]

    batch = x.shape[0]
    bp, tb = _choose_tiling(batch, block_batch)

    # Feature-major input: (4, Bp), batch on the lane axis (zero-padded rows).
    xT = jnp.pad(x.astype(compute_dtype).T, ((0, 0), (0, bp - batch)))

    grid = (bp // tb,)

    def resident(shape):
        # Same block index every grid step -> fetched once, stays in VMEM.
        return pl.BlockSpec(shape, lambda i: (0, 0))

    out = pl.pallas_call(
        _mlp_kernel,
        out_shape=jax.ShapeDtypeStruct((outp, bp), jnp.float32),
        grid=grid,
        in_specs=[
            pl.BlockSpec((in_f, tb), lambda i: (0, i)),
            resident((h1p, in_f)), resident((h1p, 1)),
            resident((h2p, h1p)), resident((h2p, 1)),
            resident((outp, h2p)), resident((outp, 1)),
        ],
        out_specs=pl.BlockSpec((outp, tb), lambda i: (0, i)),
        compiler_params=pltpu.CompilerParams(
            dimension_semantics=("parallel",),  # v7x: shard batch over both TCs
        ),
    )(xT, w1, b1, w2, b2, w3, b3)

    # Compact (8, Bp) output -> (B, num_classes); tiny slice/transpose in XLA.
    return out[:num_classes, :batch].T


def init_params(key, input_features=4, hidden_layer1=25, hidden_layer2=30, output_features=3):
    """Deterministic init mimicking PyTorch nn.Linear default (uniform +-1/sqrt(fan_in)),
    stored in torch layout: weight (out_features, in_features), bias (out_features,)."""
    ks = jax.random.split(key, 6)

    def lin(kw, kb, fan_in, fan_out):
        bound = 1.0 / jnp.sqrt(float(fan_in))
        w = jax.random.uniform(kw, (fan_out, fan_in), jnp.float32, -bound, bound)
        b = jax.random.uniform(kb, (fan_out,), jnp.float32, -bound, bound)
        return w, b

    w1, b1 = lin(ks[0], ks[1], input_features, hidden_layer1)
    w2, b2 = lin(ks[2], ks[3], hidden_layer1, hidden_layer2)
    w3, b3 = lin(ks[4], ks[5], hidden_layer2, output_features)
    return {"w1": w1, "b1": b1, "w2": w2, "b2": b2, "w3": w3, "b3": b3}


def _reference_forward(x, params):
    h1 = jnp.maximum(x @ params["w1"].T + params["b1"], 0.0)
    h2 = jnp.maximum(h1 @ params["w2"].T + params["b2"], 0.0)
    return h2 @ params["w3"].T + params["b3"]


if __name__ == "__main__":
    key = jax.random.PRNGKey(0)
    k_params, k_x = jax.random.split(key)
    params = init_params(k_params)

    batch = 8
    x = jax.random.normal(k_x, (batch, 4), dtype=jnp.float32)
    ref = _reference_forward(x, params)

    fwd = jax.jit(iris_classifier_forward)

    # f32 compute path: bit-accurate vs the reference.
    pp_f32 = prepare_params(params, compute_dtype=jnp.float32)
    out_f32 = jax.block_until_ready(fwd(x, pp_f32))
    assert out_f32.shape == (batch, 3)
    assert jnp.allclose(out_f32, ref, atol=1e-5, rtol=1e-5)

    # Default bf16-matmul / f32-accumulate path (MXU-native on v5e/v6e/v7x).
    pp_bf16 = prepare_params(params)  # compute_dtype=bfloat16
    out_bf16 = jax.block_until_ready(fwd(x, pp_bf16))
    assert out_bf16.shape == (batch, 3)
    assert jnp.allclose(out_bf16, ref, atol=5e-2, rtol=5e-2)

    print("KERNEL_OK")
</pallas_src>

<mosaic_0001>
module attributes {stable_mosaic.version = 11 : i64} {
  func.func @_mlp_kernel(%arg0: i32, %arg1: memref<4x8xf32, #tpu.memory_space<vmem>>, %arg2: memref<128x4xf32, #tpu.memory_space<vmem>>, %arg3: memref<128x1xf32, #tpu.memory_space<vmem>>, %arg4: memref<128x128xf32, #tpu.memory_space<vmem>>, %arg5: memref<128x1xf32, #tpu.memory_space<vmem>>, %arg6: memref<8x128xf32, #tpu.memory_space<vmem>>, %arg7: memref<8x1xf32, #tpu.memory_space<vmem>>, %arg8: memref<8x8xf32, #tpu.memory_space<vmem>>) attributes {dimension_semantics = [#tpu.dimension_semantics<parallel>], iteration_bounds = array<i64: 1>, scalar_prefetch = 0 : i64, scratch_operands = 0 : i64, tpu.core_type = #tpu.core_type<tc>, window_params = [{transform_indices = @transform_0, window_bounds = array<i64: 4, 8>}, {pipeline_mode = #tpu.pipeline_mode<synchronous>, transform_indices = @transform_1, window_bounds = array<i64: 128, 4>}, {pipeline_mode = #tpu.pipeline_mode<synchronous>, transform_indices = @transform_2, window_bounds = array<i64: 128, 1>}, {pipeline_mode = #tpu.pipeline_mode<synchronous>, transform_indices = @transform_3, window_bounds = array<i64: 128, 128>}, {pipeline_mode = #tpu.pipeline_mode<synchronous>, transform_indices = @transform_4, window_bounds = array<i64: 128, 1>}, {pipeline_mode = #tpu.pipeline_mode<synchronous>, transform_indices = @transform_5, window_bounds = array<i64: 8, 128>}, {pipeline_mode = #tpu.pipeline_mode<synchronous>, transform_indices = @transform_6, window_bounds = array<i64: 8, 1>}, {transform_indices = @transform_7, window_bounds = array<i64: 8, 8>}]} {
    %c0 = arith.constant 0 : index
    %c0_0 = arith.constant 0 : index
    %0 = vector.load %arg2[%c0, %c0_0] : memref<128x4xf32, #tpu.memory_space<vmem>>, vector<128x4xf32>
    %c0_1 = arith.constant 0 : index
    %c0_2 = arith.constant 0 : index
    %1 = vector.load %arg1[%c0_1, %c0_2] : memref<4x8xf32, #tpu.memory_space<vmem>>, vector<4x8xf32>
    %cst = arith.constant dense<0.000000e+00> : vector<128x8xf32>
    %2 = tpu.matmul %0, %1, %cst {dimension_numbers = #tpu.dot_dimension_numbers<[1], [0], [0], [1], [0, 0, 1, 1], [], []>} : vector<128x4xf32>, vector<4x8xf32>, vector<128x8xf32> -> vector<128x8xf32>
    %c0_3 = arith.constant 0 : index
    %c0_4 = arith.constant 0 : index
    %3 = vector.load %arg3[%c0_3, %c0_4] : memref<128x1xf32, #tpu.memory_space<vmem>>, vector<128x1xf32>
    %4 = vector.broadcast %3 : vector<128x1xf32> to vector<128x8xf32>
    %5 = arith.addf %2, %4 : vector<128x8xf32>
    %cst_5 = arith.constant 0.000000e+00 : f32
    %6 = vector.broadcast %cst_5 : f32 to vector<128x8xf32>
    %7 = arith.maximumf %5, %6 : vector<128x8xf32>
    %c0_6 = arith.constant 0 : index
    %c0_7 = arith.constant 0 : index
    %8 = vector.load %arg4[%c0_6, %c0_7] : memref<128x128xf32, #tpu.memory_space<vmem>>, vector<128x128xf32>
    %cst_8 = arith.constant dense<0.000000e+00> : vector<128x8xf32>
    %9 = tpu.matmul %8, %7, %cst_8 {dimension_numbers = #tpu.dot_dimension_numbers<[1], [0], [0], [1], [0, 0, 1, 1], [], []>} : vector<128x128xf32>, vector<128x8xf32>, vector<128x8xf32> -> vector<128x8xf32>
    %c0_9 = arith.constant 0 : index
    %c0_10 = arith.constant 0 : index
    %10 = vector.load %arg5[%c0_9, %c0_10] : memref<128x1xf32, #tpu.memory_space<vmem>>, vector<128x1xf32>
    %11 = vector.broadcast %10 : vector<128x1xf32> to vector<128x8xf32>
    %12 = arith.addf %9, %11 : vector<128x8xf32>
    %cst_11 = arith.constant 0.000000e+00 : f32
    %13 = vector.broadcast %cst_11 : f32 to vector<128x8xf32>
    %14 = arith.maximumf %12, %13 : vector<128x8xf32>
    %c0_12 = arith.constant 0 : index
    %c0_13 = arith.constant 0 : index
    %15 = vector.load %arg6[%c0_12, %c0_13] : memref<8x128xf32, #tpu.memory_space<vmem>>, vector<8x128xf32>
    %cst_14 = arith.constant dense<0.000000e+00> : vector<8x8xf32>
    %16 = tpu.matmul %15, %14, %cst_14 {dimension_numbers = #tpu.dot_dimension_numbers<[1], [0], [0], [1], [0, 0, 1, 1], [], []>} : vector<8x128xf32>, vector<128x8xf32>, vector<8x8xf32> -> vector<8x8xf32>
    %c0_15 = arith.constant 0 : index
    %c0_16 = arith.constant 0 : index
    %17 = vector.load %arg7[%c0_15, %c0_16] : memref<8x1xf32, #tpu.memory_space<vmem>>, vector<8x1xf32>
    %18 = vector.broadcast %17 : vector<8x1xf32> to vector<8x8xf32>
    %19 = arith.addf %16, %18 : vector<8x8xf32>
    %c0_17 = arith.constant 0 : index
    %c0_18 = arith.constant 0 : index
    %20 = vector.load %arg8[%c0_17, %c0_18] : memref<8x8xf32, #tpu.memory_space<vmem>>, vector<8x8xf32>
    tpu.vector_store %arg8[%c0_17, %c0_18], %19 {strides = array<i32>} : memref<8x8xf32, #tpu.memory_space<vmem>>, vector<8x8xf32>,
    return
  }
  func.func @transform_0(%arg0: i32) -> (i32, i32) {
    %c0_i32 = arith.constant 0 : i32
    %c0_i32_0 = arith.constant 0 : i32
    return %c0_i32, %arg0 : i32, i32
  }
  func.func @transform_1(%arg0: i32) -> (i32, i32) {
    %c0_i32 = arith.constant 0 : i32
    %c0_i32_0 = arith.constant 0 : i32
    %c0_i32_1 = arith.constant 0 : i32
    return %c0_i32, %c0_i32_0 : i32, i32
  }
  func.func @transform_2(%arg0: i32) -> (i32, i32) {
    %c0_i32 = arith.constant 0 : i32
    %c0_i32_0 = arith.constant 0 : i32
    %c0_i32_1 = arith.constant 0 : i32
    return %c0_i32, %c0_i32_0 : i32, i32
  }
  func.func @transform_3(%arg0: i32) -> (i32, i32) {
    %c0_i32 = arith.constant 0 : i32
    %c0_i32_0 = arith.constant 0 : i32
    %c0_i32_1 = arith.constant 0 : i32
    return %c0_i32, %c0_i32_0 : i32, i32
  }
  func.func @transform_4(%arg0: i32) -> (i32, i32) {
    %c0_i32 = arith.constant 0 : i32
    %c0_i32_0 = arith.constant 0 : i32
    %c0_i32_1 = arith.constant 0 : i32
    return %c0_i32, %c0_i32_0 : i32, i32
  }
  func.func @transform_5(%arg0: i32) -> (i32, i32) {
    %c0_i32 = arith.constant 0 : i32
    %c0_i32_0 = arith.constant 0 : i32
    %c0_i32_1 = arith.constant 0 : i32
    return %c0_i32, %c0_i32_0 : i32, i32
  }
  func.func @transform_6(%arg0: i32) -> (i32, i32) {
    %c0_i32 = arith.constant 0 : i32
    %c0_i32_0 = arith.constant 0 : i32
    %c0_i32_1 = arith.constant 0 : i32
    return %c0_i32, %c0_i32_0 : i32, i32
  }
  func.func @transform_7(%arg0: i32) -> (i32, i32) {
    %c0_i32 = arith.constant 0 : i32
    %c0_i32_0 = arith.constant 0 : i32
    return %c0_i32, %arg0 : i32, i32
  }
}

</mosaic_0001>

<bundles_post_ra>
// kernel: iris_classifier_forward.1
= control target key start
LH: loop header
LB: loop body
LE: loop exit
PB: predicated region body
PF: predicated region fallthrough
CT: control target
= control target key end

     0   :  { %vm188_vm0 = vcmask 1043456   ;;  %v537_v0 = vmov 0   ;;  %vm139_vm1 = vcmask 31744   ;;  %vm493_vm2 = vcmask 64512   ;;  %s816_s2 = inlined_call_operand.vmem [shape: f32[128,1], index: 2, kind: input, shape index: {}]   ;;  %s817_s0 = inlined_call_operand.vmem [shape: f32[4,8], index: 0, kind: input, shape index: {}]   ;;  %s818_s1 = inlined_call_operand.vmem [shape: f32[128,4], index: 1, kind: input, shape index: {}]   ;;  %s819_s4 = inlined_call_operand.vmem [shape: f32[128,1], index: 4, kind: input, shape index: {}]   ;;  %s820_s6 = inlined_call_operand.vmem [shape: f32[8,1], index: 6, kind: input, shape index: {}]   ;;  %s821_s3 = inlined_call_operand.vmem [shape: f32[128,128], index: 3, kind: input, shape index: {}]   ;;  %s822_s5 = inlined_call_operand.vmem [shape: f32[8,128], index: 5, kind: input, shape index: {}]   ;;  %s823_s7 = inlined_call_operand.vmem [shape: f32[8,8], index: 7, kind: output, shape index: {}]  }
   0x1   :  { %535 = vset.pattern.permute.xlu1 %v537_v0  ;;  %534 = vset.pattern.permute.xlu0 %v537_v0  ;;  %v58_v1 = vld [vmem:[%s816_s2 + $0x78] sm:$0xff]  ;;  %v56_v2 = vld [vmem:[%s816_s2 + $0x68] sm:$0xff]  ;;  %v42_v3 = vld [vmem:[%s817_s0] sm:$0xf] }
   0x2   :  { %136 = vperm.xlu0 %534, %v58_v1   ;;  %126 = vperm.xlu1 %535, %v56_v2   ;;  %v26_v4 = vld [vmem:[%s818_s1] sm:$0xff]  ;;  %v37_v5 = vld [vmem:[%s818_s1 + $0x58] sm:$0xff]  ;;  %v57_v7 = vld [vmem:[%s816_s2 + $0x70] sm:$0xff] }
   0x3   :  { %499 = vmatpush.msk.msra.mxu0 %vm188_vm0, %v42_v3  ;;  %516 = vmatpush.msk.msra.mxu2 %vm188_vm0, %v42_v3  ;;  %v54_v6 = vld [vmem:[%s816_s2 + $0x58] sm:$0xff]  ;;  %v55_v8 = vld [vmem:[%s816_s2 + $0x60] sm:$0xff]  ;;  %v27_v9 = vld [vmem:[%s818_s1 + $0x8] sm:$0xff] }
   0x4   :  { %500 = vmatmul.msk.f32.vlgmr.msra.gmra.mxu0 %vm139_vm1, %v26_v4  ;;  %511 = vmatmul.msk.f32.vlgmr.msra.gmra.mxu2 %vm139_vm1, %v37_v5  ;;  %v38_v10 = vld [vmem:[%s818_s1 + $0x60] sm:$0xff]  ;;  %v53_v11 = vld [vmem:[%s816_s2 + $0x50] sm:$0xff]  ;;  %v52_v12 = vld [vmem:[%s816_s2 + $0x48] sm:$0xff] }
   0x5   :  { %536 = vset.pattern.permute.xlu2 %v537_v0  ;;  %v51_v13 = vld [vmem:[%s816_s2 + $0x40] sm:$0xff]  ;;  %v28_v14 = vld [vmem:[%s818_s1 + $0x10] sm:$0xff]  ;;  %v39_v15 = vld [vmem:[%s818_s1 + $0x68] sm:$0xff] }
   0x6   :  { %116 = vperm.xlu2 %536, %v54_v6   ;;  %v50_v16 = vld [vmem:[%s816_s2 + $0x38] sm:$0xff]  ;;  %v49_v17 = vld [vmem:[%s816_s2 + $0x30] sm:$0xff]  ;;  %v48_v18 = vld [vmem:[%s816_s2 + $0x28] sm:$0xff] }
   0x7   :  { %v29_v19 = vld [vmem:[%s818_s1 + $0x18] sm:$0xff]  ;;  %v40_v20 = vld [vmem:[%s818_s1 + $0x70] sm:$0xff]  ;;  %v47_v21 = vld [vmem:[%s816_s2 + $0x20] sm:$0xff] }
   0x8   :  { %v46_v22 = vld [vmem:[%s816_s2 + $0x18] sm:$0xff]  ;;  %v45_v23 = vld [vmem:[%s816_s2 + $0x10] sm:$0xff]  ;;  %v30_v24 = vld [vmem:[%s818_s1 + $0x20] sm:$0xff] }
   0x9   :  { %v41_v25 = vld [vmem:[%s818_s1 + $0x78] sm:$0xff]  ;;  %v44_v26 = vld [vmem:[%s816_s2 + $0x8] sm:$0xff]  ;;  %v43_v28 = vld [vmem:[%s816_s2] sm:$0xff] }
   0xa   :  { %131 = vperm.xlu0 %534, %v57_v7   ;;  %121 = vperm.xlu1 %535, %v55_v8   ;;  %v304_v27 = vld [vmem:[%s819_s4 + $0x78] sm:$0xff]  ;;  %v31_v29 = vld [vmem:[%s818_s1 + $0x28] sm:$0xff]  ;;  %v303_v30 = vld [vmem:[%s819_s4 + $0x70] sm:$0xff] }
   0xb   :  { %v301_v31 = vld [vmem:[%s819_s4 + $0x60] sm:$0xff]  ;;  %v302_v32 = vld [vmem:[%s819_s4 + $0x68] sm:$0xff]  ;;  %v32_v33 = vld [vmem:[%s818_s1 + $0x30] sm:$0xff] }
   0xc   :  { %501 = vmatmul.msk.f32.gmra.mxu0 %vm139_vm1, %v27_v9  ;;  %512 = vmatmul.msk.f32.gmra.mxu2 %vm139_vm1, %v38_v10  ;;  %v300_v34 = vld [vmem:[%s819_s4 + $0x58] sm:$0xff]  ;;  %v298_v35 = vld [vmem:[%s819_s4 + $0x48] sm:$0xff]  ;;  %v299_v36 = vld [vmem:[%s819_s4 + $0x50] sm:$0xff] }
   0xd   :  { %v33_v37 = vld [vmem:[%s818_s1 + $0x38] sm:$0xff]  ;;  %v297_v38 = vld [vmem:[%s819_s4 + $0x40] sm:$0xff]  ;;  %v295_v39 = vld [vmem:[%s819_s4 + $0x30] sm:$0xff] }
   0xe   :  { %111 = vperm.xlu2 %536, %v53_v11   ;;  %v296_v40 = vld [vmem:[%s819_s4 + $0x38] sm:$0xff]  ;;  %v34_v41 = vld [vmem:[%s818_s1 + $0x40] sm:$0xff]  ;;  %v294_v42 = vld [vmem:[%s819_s4 + $0x28] sm:$0xff] }
   0xf   :  { %v292_v43 = vld [vmem:[%s819_s4 + $0x18] sm:$0xff]  ;;  %v293_v44 = vld [vmem:[%s819_s4 + $0x20] sm:$0xff]  ;;  %v35_v45 = vld [vmem:[%s818_s1 + $0x48] sm:$0xff] }
  0x10   :  { %v291_v46 = vld [vmem:[%s819_s4 + $0x10] sm:$0xff]  ;;  %v289_v47 = vld [vmem:[%s819_s4] sm:$0xff]  ;;  %v290_v48 = vld [vmem:[%s819_s4 + $0x8] sm:$0xff] }
  0x11   :  { %v36_v49 = vld [vmem:[%s818_s1 + $0x50] sm:$0xff]  ;;  %v467_v50 = vld [vmem:[%s820_s6] sm:$0xff] }
  0x12   :  { %106 = vperm.xlu0 %534, %v52_v12   ;;  %101 = vperm.xlu1 %535, %v51_v13  }
  0x14   :  { %502 = vmatmul.msk.f32.gmra.mxu0 %vm139_vm1, %v28_v14  ;;  %513 = vmatmul.msk.f32.gmra.mxu2 %vm139_vm1, %v39_v15 }
  0x16   :  { %96 = vperm.xlu2 %536, %v50_v16  }
  0x1a   :  { %91 = vperm.xlu0 %534, %v49_v17   ;;  %86 = vperm.xlu1 %535, %v48_v18  }
  0x1c   :  { %503 = vmatmul.msk.f32.gmra.mxu0 %vm139_vm1, %v29_v19  ;;  %514 = vmatmul.msk.f32.gmra.mxu2 %vm139_vm1, %v40_v20 }
  0x1e   :  { %81 = vperm.xlu2 %536, %v47_v21  }
  0x22   :  { %76 = vperm.xlu0 %534, %v46_v22   ;;  %71 = vperm.xlu1 %535, %v45_v23  }
  0x24   :  { %504 = vmatmul.msk.f32.gmra.mxu0 %vm139_vm1, %v30_v24  ;;  %515 = vmatmul.msk.f32.gmra.mxu2 %vm139_vm1, %v41_v25 }
  0x26   :  { %66 = vperm.xlu2 %536, %v44_v26  }
  0x2a   :  { %382 = vperm.xlu1 %535, %v304_v27   ;;  %61 = vperm.xlu0 %534, %v43_v28  }
  0x2c   :  { %505 = vmatmul.msk.f32.gmra.mxu0 %vm139_vm1, %v31_v29 }
  0x2e   :  { %377 = vperm.xlu2 %536, %v303_v30  }
  0x32   :  { %367 = vperm.xlu1 %535, %v301_v31   ;;  %372 = vperm.xlu0 %534, %v302_v32  }
  0x34   :  { %506 = vmatmul.msk.f32.gmra.mxu0 %vm139_vm1, %v32_v33 }
  0x36   :  { %362 = vperm.xlu2 %536, %v300_v34  }
  0x3a   :  { %352 = vperm.xlu1 %535, %v298_v35   ;;  %357 = vperm.xlu0 %534, %v299_v36  }
  0x3c   :  { %507 = vmatmul.msk.f32.gmra.mxu0 %vm139_vm1, %v33_v37 }
  0x3e   :  { %347 = vperm.xlu2 %536, %v297_v38  }
  0x42   :  { %337 = vperm.xlu1 %535, %v295_v39   ;;  %342 = vperm.xlu0 %534, %v296_v40  }
  0x44   :  { %508 = vmatmul.msk.f32.gmra.mxu0 %vm139_vm1, %v34_v41 }
  0x46   :  { %332 = vperm.xlu2 %536, %v294_v42  }
  0x4a   :  { %322 = vperm.xlu1 %535, %v292_v43   ;;  %327 = vperm.xlu0 %534, %v293_v44  }
  0x4c   :  { %509 = vmatmul.msk.f32.gmra.mxu0 %vm139_vm1, %v35_v45 }
  0x4e   :  { %317 = vperm.xlu2 %536, %v291_v46  }
  0x52   :  { %307 = vperm.xlu1 %535, %v289_v47   ;;  %312 = vperm.xlu0 %534, %v290_v48  }
  0x54   :  { %510 = vmatmul.msk.f32.gmra.mxu0 %vm139_vm1, %v36_v49 }
  0x56   :  { %470 = vperm.xlu2 %536, %v467_v50  }
  0x60   :  { %v117_v9 = vpop.permute.xlu2 %116 }
  0x68   :  { %v112_v15 = vpop.permute.xlu2 %111 }
  0x70   :  { %v97_v20 = vpop.permute.xlu2 %96 }
  0x74   :  { %v137_v58 = vpop.permute.xlu0 %136  ;;  %v127_v59 = vpop.permute.xlu1 %126 }
  0x78   :  { %v82_v28 = vpop.permute.xlu2 %81 }
  0x7c   :  { %v132_v62 = vpop.permute.xlu0 %131  ;;  %v122_v3 = vpop.permute.xlu1 %121 }
  0x80   :  { %v67_v41 = vpop.permute.xlu2 %66 }
  0x81   :  { %v744_v51 = vpop.f32.mrf.mxu0 }
  0x84   :  { %v107_v17 = vpop.permute.xlu0 %106  ;;  %v102_v18 = vpop.permute.xlu1 %101 }
  0x87   :  { %v242_v52 = vpop.f32.mrf.mxu2 }
  0x88   :  { %v243_v10 = vadd.f32 %v242_v52, %v117_v9  ;;  %v273_v52 = vld [vmem:[%s821_s3] sm:$0xff] }
  0x89   :  { %v746_v53 = vpop.f32.mrf.mxu0 }
  0x8a   :  { %v268_v13 = vmax.f32 %v243_v10, 0.0  ;;  %v213_v45 = vadd.f32 %v746_v53, %v67_v41  ;;  %v281_v53 = vld [vmem:[%s821_s3 + $0x40] sm:$0xff] }
  0x8c   :  { %v92_v21 = vpop.permute.xlu0 %91  ;;  %v87_v25 = vpop.permute.xlu1 %86  ;;  %v258_v49 = vmax.f32 %v213_v45, 0.0 }
  0x8f   :  { %v245_v54 = vpop.f32.mrf.mxu2 }
  0x90   :  { %v246_v5 = vadd.f32 %v245_v54, %v122_v3  ;;  %v282_v54 = vld [vmem:[%s821_s3 + $0x48] sm:$0xff] }
  0x91   :  { %v748_v55 = vpop.f32.mrf.mxu0 }
  0x92   :  { %v269_v11 = vmax.f32 %v246_v5, 0.0 }
  0x94   :  { %v77_v31 = vpop.permute.xlu0 %76  ;;  %v72_v38 = vpop.permute.xlu1 %71 }
  0x95   :  { %v216_v42 = vadd.f32 %v748_v55, %v72_v38  ;;  %v275_v55 = vld [vmem:[%s821_s3 + $0x10] sm:$0xff] }
  0x97   :  { %v248_v56 = vpop.f32.mrf.mxu2  ;;  %v259_v47 = vmax.f32 %v216_v42, 0.0 }
  0x98   :  { %v249_v1 = vadd.f32 %v248_v56, %v127_v59  ;;  %v283_v56 = vld [vmem:[%s821_s3 + $0x50] sm:$0xff]  ;;  %v277_v59 = vld [vmem:[%s821_s3 + $0x20] sm:$0xff] }
  0x99   :  { %v750_v57 = vpop.f32.mrf.mxu0 }
  0x9a   :  { %v270_v8 = vmax.f32 %v249_v1, 0.0  ;;  %v219_v39 = vadd.f32 %v750_v57, %v77_v31  ;;  %v276_v57 = vld [vmem:[%s821_s3 + $0x18] sm:$0xff] }
  0x9b   :  { %v280_v1 = vld [vmem:[%s821_s3 + $0x38] sm:$0xff] }
  0x9c   :  { %v62_v44 = vpop.permute.xlu0 %61  ;;  %v260_v46 = vmax.f32 %v219_v39, 0.0 }
  0x9d   :  { %v210_v48 = vadd.f32 %v744_v51, %v62_v44  ;;  %v274_v51 = vld [vmem:[%s821_s3 + $0x8] sm:$0xff] }
  0x9f   :  { %v251_v60 = vpop.f32.mrf.mxu2  ;;  %v257_v50 = vmax.f32 %v210_v48, 0.0 }
  0xa0   :  { %v252_v63 = vadd.f32 %v251_v60, %v132_v62  ;;  %v285_v60 = vld [vmem:[%s821_s3 + $0x60] sm:$0xff]  ;;  %v286_v62 = vld [vmem:[%s821_s3 + $0x68] sm:$0xff] }
  0xa1   :  { %v221_v61 = vpop.f32.mrf.mxu0 }
  0xa2   :  { %v271_v6 = vmax.f32 %v252_v63, 0.0  ;;  %v222_v36 = vadd.f32 %v221_v61, %v82_v28  ;;  %v278_v61 = vld [vmem:[%s821_s3 + $0x28] sm:$0xff]  ;;  %v279_v63 = vld [vmem:[%s821_s3 + $0x30] sm:$0xff] }
  0xa4   :  { %v261_v43 = vmax.f32 %v222_v36, 0.0 }
  0xa7   :  { %v254_v0 = vpop.f32.mrf.mxu2 }
  0xa8   :  { %v255_v2 = vadd.f32 %v254_v0, %v137_v58  ;;  %v284_v58 = vld [vmem:[%s821_s3 + $0x58] sm:$0xff]  ;;  %v287_v0 = vld [vmem:[%s821_s3 + $0x70] sm:$0xff] }
  0xa9   :  { %v224_v4 = vpop.f32.mrf.mxu0 }
  0xaa   :  { %v272_v7 = vmax.f32 %v255_v2, 0.0  ;;  %v225_v34 = vadd.f32 %v224_v4, %v87_v25  ;;  %v288_v2 = vld [vmem:[%s821_s3 + $0x78] sm:$0xff] }
  0xac   :  { %385 = vmatpush.msra.mxu1 %v272_v7  ;;  %517 = vmatpush.msra.mxu3 %v272_v7  ;;  %v262_v40 = vmax.f32 %v225_v34, 0.0 }
  0xae   :  { %386 = vmatpush.msra.mxu1 %v271_v6  ;;  %518 = vmatpush.msra.mxu3 %v271_v6 }
  0xb0   :  { %387 = vmatpush.msra.mxu1 %v270_v8  ;;  %519 = vmatpush.msra.mxu3 %v270_v8 }
  0xb1   :  { %v227_v12 = vpop.f32.mrf.mxu0 }
  0xb2   :  { %388 = vmatpush.msra.mxu1 %v269_v11  ;;  %520 = vmatpush.msra.mxu3 %v269_v11  ;;  %v228_v32 = vadd.f32 %v227_v12, %v92_v21  ;;  %v383_v12 = vpop.permute.xlu1 %382 }
  0xb4   :  { %389 = vmatpush.msra.mxu1 %v268_v13  ;;  %521 = vmatpush.msra.mxu3 %v268_v13  ;;  %v263_v37 = vmax.f32 %v228_v32, 0.0 }
  0xb9   :  { %v230_v14 = vpop.f32.mrf.mxu0 }
  0xba   :  { %v231_v29 = vadd.f32 %v230_v14, %v97_v20  ;;  %v378_v14 = vpop.permute.xlu2 %377 }
  0xbc   :  { %v264_v35 = vmax.f32 %v231_v29, 0.0 }
  0xc1   :  { %v233_v16 = vpop.f32.mrf.mxu0 }
  0xc2   :  { %v234_v26 = vadd.f32 %v233_v16, %v102_v18  ;;  %v373_v16 = vpop.permute.xlu0 %372  ;;  %v363_v20 = vpop.permute.xlu2 %362 }
  0xc4   :  { %v265_v33 = vmax.f32 %v234_v26, 0.0 }
  0xc9   :  { %v236_v19 = vpop.f32.mrf.mxu0 }
  0xca   :  { %v237_v23 = vadd.f32 %v236_v19, %v107_v17  ;;  %v368_v17 = vpop.permute.xlu1 %367  ;;  %v358_v21 = vpop.permute.xlu0 %357 }
  0xcb   :  { %v348_v29 = vpop.permute.xlu2 %347 }
  0xcc   :  { %v266_v30 = vmax.f32 %v237_v23, 0.0 }
  0xd1   :  { %v239_v22 = vpop.f32.mrf.mxu0 }
  0xd2   :  { %v240_v24 = vadd.f32 %v239_v22, %v112_v15  ;;  %v353_v22 = vpop.permute.xlu1 %352  ;;  %v343_v32 = vpop.permute.xlu0 %342 }
  0xd4   :  { %v267_v27 = vmax.f32 %v240_v24, 0.0 }
  0xd6   :  { %390 = vmatpush.msra.mxu1 %v267_v27  ;;  %522 = vmatpush.msra.mxu3 %v267_v27 }
  0xd8   :  { %391 = vmatpush.msra.mxu1 %v266_v30  ;;  %523 = vmatpush.msra.mxu3 %v266_v30 }
  0xda   :  { %392 = vmatpush.msra.mxu1 %v265_v33  ;;  %524 = vmatpush.msra.mxu3 %v265_v33 }
  0xdc   :  { %393 = vmatpush.msra.mxu1 %v264_v35  ;;  %525 = vmatpush.msra.mxu3 %v264_v35  ;;  %v338_v35 = vpop.permute.xlu1 %337 }
  0xde   :  { %394 = vmatpush.msra.mxu1 %v263_v37  ;;  %526 = vmatpush.msra.mxu3 %v263_v37 }
  0xe0   :  { %395 = vmatpush.msra.mxu1 %v262_v40  ;;  %527 = vmatpush.msra.mxu3 %v262_v40 }
  0xe2   :  { %396 = vmatpush.msra.mxu1 %v261_v43  ;;  %528 = vmatpush.msra.mxu3 %v261_v43  ;;  %v333_v43 = vpop.permute.xlu2 %332 }
  0xe4   :  { %397 = vmatpush.msra.mxu1 %v260_v46  ;;  %529 = vmatpush.msra.mxu3 %v260_v46  ;;  %v328_v46 = vpop.permute.xlu0 %327 }
  0xe6   :  { %398 = vmatpush.msra.mxu1 %v259_v47  ;;  %530 = vmatpush.msra.mxu3 %v259_v47 }
  0xe8   :  { %399 = vmatpush.msra.mxu1 %v258_v49  ;;  %531 = vmatpush.msra.mxu3 %v258_v49  ;;  %v323_v49 = vpop.permute.xlu1 %322 }
  0xea   :  { %400 = vmatpush.msra.mxu1 %v257_v50  ;;  %532 = vmatpush.msra.mxu3 %v257_v50 }
  0xeb   :  { %401 = vmatmul.f32.vlgmr.msra.gmra.mxu1 %v273_v52  ;;  %425 = vmatmul.f32.vlgmr.msra.gmra.mxu3 %v281_v53 }
  0xf3   :  { %404 = vmatmul.f32.gmra.mxu1 %v274_v51  ;;  %428 = vmatmul.f32.gmra.mxu3 %v282_v54 }
  0xfb   :  { %407 = vmatmul.f32.gmra.mxu1 %v275_v55  ;;  %431 = vmatmul.f32.gmra.mxu3 %v283_v56  ;;  %v318_v56 = vpop.permute.xlu2 %317 }
 0x103   :  { %410 = vmatmul.f32.gmra.mxu1 %v276_v57  ;;  %434 = vmatmul.f32.gmra.mxu3 %v284_v58 }
 0x10b   :  { %413 = vmatmul.f32.gmra.mxu1 %v277_v59  ;;  %437 = vmatmul.f32.gmra.mxu3 %v285_v60  ;;  %v313_v59 = vpop.permute.xlu0 %312 }
 0x113   :  { %416 = vmatmul.f32.gmra.mxu1 %v278_v61  ;;  %440 = vmatmul.f32.gmra.mxu3 %v286_v62  ;;  %v308_v62 = vpop.permute.xlu1 %307 }
 0x11b   :  { %419 = vmatmul.f32.gmra.mxu1 %v279_v63  ;;  %443 = vmatmul.f32.gmra.mxu3 %v287_v0 }
 0x123   :  { %422 = vmatmul.f32.gmra.mxu1 %v280_v1  ;;  %446 = vmatmul.f32.gmra.mxu3 %v288_v2 }
 0x168   :  { %v804_v3 = vpop.f32.mrf.mxu1 }
 0x169   :  { %v403_v63 = vadd.f32 %v804_v3, %v308_v62 }
 0x16b   :  { %v450_v2 = vmax.f32 %v403_v63, 0.0 }
 0x16e   :  { %v426_v4 = vpop.f32.mrf.mxu3 }
 0x16f   :  { %v427_v41 = vadd.f32 %v426_v4, %v348_v29  ;;  %v466_v4 = vld [vmem:[%s822_s5] sm:$0xff] }
 0x170   :  { %v806_v5 = vpop.f32.mrf.mxu1 }
 0x171   :  { %v458_v47 = vmax.f32 %v427_v41, 0.0  ;;  %v406_v60 = vadd.f32 %v806_v5, %v313_v59 }
 0x173   :  { %v451_v1 = vmax.f32 %v406_v60, 0.0 }
 0x176   :  { %v429_v6 = vpop.f32.mrf.mxu3 }
 0x177   :  { %v430_v38 = vadd.f32 %v429_v6, %v353_v22  ;;  %v471_v6 = vpop.permute.xlu2 %470 }
 0x178   :  { %v408_v8 = vpop.f32.mrf.mxu1 }
 0x179   :  { %v459_v44 = vmax.f32 %v430_v38, 0.0  ;;  %v409_v57 = vadd.f32 %v408_v8, %v318_v56 }
 0x17b   :  { %v452_v0 = vmax.f32 %v409_v57, 0.0 }
 0x17e   :  { %v432_v7 = vpop.f32.mrf.mxu3 }
 0x17f   :  { %v433_v36 = vadd.f32 %v432_v7, %v358_v21 }
 0x180   :  { %v411_v10 = vpop.f32.mrf.mxu1 }
 0x181   :  { %v460_v42 = vmax.f32 %v433_v36, 0.0  ;;  %v412_v54 = vadd.f32 %v411_v10, %v323_v49 }
 0x183   :  { %v453_v61 = vmax.f32 %v412_v54, 0.0 }
 0x186   :  { %v435_v9 = vpop.f32.mrf.mxu3 }
 0x187   :  { %v436_v33 = vadd.f32 %v435_v9, %v363_v20 }
 0x188   :  { %v414_v13 = vpop.f32.mrf.mxu1 }
 0x189   :  { %v461_v39 = vmax.f32 %v436_v33, 0.0  ;;  %v415_v53 = vadd.f32 %v414_v13, %v328_v46 }
 0x18b   :  { %v454_v58 = vmax.f32 %v415_v53, 0.0 }
 0x18e   :  { %v438_v11 = vpop.f32.mrf.mxu3 }
 0x18f   :  { %v439_v30 = vadd.f32 %v438_v11, %v368_v17 }
 0x190   :  { %v417_v18 = vpop.f32.mrf.mxu1 }
 0x191   :  { %v462_v37 = vmax.f32 %v439_v30, 0.0  ;;  %v418_v50 = vadd.f32 %v417_v18, %v333_v43 }
 0x193   :  { %v455_v55 = vmax.f32 %v418_v50, 0.0 }
 0x196   :  { %v441_v15 = vpop.f32.mrf.mxu3 }
 0x197   :  { %v442_v27 = vadd.f32 %v441_v15, %v373_v16 }
 0x198   :  { %v420_v26 = vpop.f32.mrf.mxu1 }
 0x199   :  { %v463_v34 = vmax.f32 %v442_v27, 0.0  ;;  %v421_v48 = vadd.f32 %v420_v26, %v338_v35 }
 0x19b   :  { %v456_v51 = vmax.f32 %v421_v48, 0.0 }
 0x19e   :  { %v444_v19 = vpop.f32.mrf.mxu3 }
 0x19f   :  { %v445_v24 = vadd.f32 %v444_v19, %v378_v14 }
 0x1a0   :  { %v423_v40 = vpop.f32.mrf.mxu1 }
 0x1a1   :  { %v464_v31 = vmax.f32 %v445_v24, 0.0  ;;  %v424_v45 = vadd.f32 %v423_v40, %v343_v32 }
 0x1a3   :  { %v457_v52 = vmax.f32 %v424_v45, 0.0 }
 0x1a6   :  { %v447_v23 = vpop.f32.mrf.mxu3 }
 0x1a7   :  { %v448_v25 = vadd.f32 %v447_v23, %v383_v12 }
 0x1a9   :  { %v465_v28 = vmax.f32 %v448_v25, 0.0 }
 0x1ab   :  { %473 = vmatpush.msrb.mxu2 %v465_v28 }
 0x1ad   :  { %474 = vmatpush.msrb.mxu2 %v464_v31 }
 0x1af   :  { %475 = vmatpush.msrb.mxu2 %v463_v34 }
 0x1b1   :  { %476 = vmatpush.msrb.mxu2 %v462_v37 }
 0x1b3   :  { %477 = vmatpush.msrb.mxu2 %v461_v39 }
 0x1b5   :  { %478 = vmatpush.msrb.mxu2 %v460_v42 }
 0x1b7   :  { %479 = vmatpush.msrb.mxu2 %v459_v44 }
 0x1b9   :  { %480 = vmatpush.msrb.mxu2 %v458_v47 }
 0x1bb   :  { %481 = vmatpush.msrb.mxu2 %v457_v52 }
 0x1bd   :  { %482 = vmatpush.msrb.mxu2 %v456_v51 }
 0x1bf   :  { %483 = vmatpush.msrb.mxu2 %v455_v55 }
 0x1c1   :  { %484 = vmatpush.msrb.mxu2 %v454_v58 }
 0x1c3   :  { %485 = vmatpush.msrb.mxu2 %v453_v61 }
 0x1c5   :  { %486 = vmatpush.msrb.mxu2 %v452_v0 }
 0x1c7   :  { %487 = vmatpush.msrb.mxu2 %v451_v1 }
 0x1c9   :  { %488 = vmatpush.msrb.mxu2 %v450_v2 }
 0x1ca   :  { %489 = vmatmul.f32.vlgmr.msrb.gmra.mxu2 %v466_v4 }
 0x24d   :  { %v490_v7 = vpop.f32.mrf.mxu2 }
 0x24e   :  { %v491_v5 = vadd.f32 %v490_v7, %v471_v6 }
 0x250   :  { %494 = vst.msk [vmem:[%s823_s7] sm:$0xff] %vm493_vm2, %v491_v5 }

</bundles_post_ra>
